<compile_context>
chip_gen: v7x
topology: tpu7x:2x2x1
jax: 0.10.0
libtpu: 0.0.40
codegen_flags: <defaults>
</compile_context>

<pallas_src>
import functools

import jax
import jax.numpy as jnp
from jax import lax
from jax.experimental import pallas as pl
from jax.experimental.pallas import tpu as pltpu


# Contract the last dim of both operands: (m, k) . (n, k) -> (m, n)  (i.e. A @ B^T).
_T_DIMS = (((1,), (1,)), ((), ()))


def _losparse_kernel(x_ref, wr_ref, wl_ref, *rest, has_sparse, has_bias):
    # x_ref:  (tm, D)   row tile (resident across the inner N loop)
    # wr_ref: (R, D)    full right weight (tiny, resident)
    # wl_ref: (tn, R)   N-block of left weight
    # [ws_ref]: (tn, D) N-block of sparse weight   (if has_sparse)
    # [b_ref]:  (1, tn) N-block of bias (f32)      (if has_bias)
    # o_ref:  (tm, tn)
    # rx_ref: (tm, R)   f32 scratch: cached low-rank projection for this M tile
    idx = 0
    ws_ref = rest[idx] if has_sparse else None
    idx += 1 if has_sparse else 0
    b_ref = rest[idx] if has_bias else None
    idx += 1 if has_bias else 0
    o_ref = rest[idx]
    rx_ref = rest[idx + 1]

    j = pl.program_id(1)

    # Compute rx = x @ Wr^T once per M tile; reuse for every N block.
    @pl.when(j == 0)
    def _():
        rx_ref[...] = lax.dot_general(
            x_ref[...], wr_ref[...], _T_DIMS, preferred_element_type=jnp.float32)

    # Low-rank path: (tm, R) @ (tn, R)^T -> (tm, tn). f32 accumulation.
    acc = lax.dot_general(rx_ref[...].astype(wl_ref.dtype), wl_ref[...], _T_DIMS,
                          preferred_element_type=jnp.float32)

    if has_sparse:
        acc = acc + lax.dot_general(x_ref[...], ws_ref[...], _T_DIMS,
                                    preferred_element_type=jnp.float32)
    if has_bias:
        acc = acc + b_ref[...].astype(jnp.float32)

    o_ref[...] = acc.astype(o_ref.dtype)


def _round_up(v, m):
    return ((v + m - 1) // m) * m


def linear_losparse(x, right_w, left_w, sparse_w=None, bias=None, *,
                    tm=256, tn=256, compute_dtype=None):
    """Fused LinearLoSparse forward.

    x:        (B, L, in_feature)
    right_w:  (reduced_rank, in_feature)
    left_w:   (out_feature, reduced_rank)
    sparse_w: (out_feature, in_feature) or None   (has_sparse=False)
    bias:     (out_feature,)            or None   (has_bias=False)
    compute_dtype: dtype for MXU operands (e.g. jnp.bfloat16); None -> x.dtype.
                   Accumulation / bias epilogue are always f32.
    """
    B, L, D = x.shape
    R, Din = right_w.shape
    O, Rin = left_w.shape
    assert Din == D and Rin == R
    has_sparse = sparse_w is not None
    has_bias = bias is not None
    if has_sparse:
        assert sparse_w.shape == (O, D)
    if has_bias:
        assert bias.shape == (O,)

    out_dtype = x.dtype
    cdt = jnp.dtype(compute_dtype) if compute_dtype is not None else jnp.dtype(x.dtype)

    # --- Row (M) tiling: big tiles, zero-pad tail rows. ---------------------
    M = B * L
    if M <= tm:
        m_pad = _round_up(M, 8)
        tm_eff = m_pad
    else:
        m_pad = _round_up(M, tm)
        tm_eff = tm

    # --- Output (N) tiling: 128-multiple, or full O for small/odd shapes. ---
    if O % tn == 0:
        tn_eff = tn
    elif O % 128 == 0:
        tn_eff = 128
    else:
        tn_eff = O  # full-dim block (always legal)

    n_blocks = O // tn_eff
    m_blocks = m_pad // tm_eff

    # --- Operands (natural layouts, no HBM transpose). ----------------------
    x2 = x.reshape(M, D).astype(cdt)
    if m_pad != M:
        x2 = jnp.pad(x2, ((0, m_pad - M), (0, 0)))
    wr = right_w.astype(cdt)                      # (R, D)
    wl = left_w.astype(cdt)                       # (O, R)

    inputs = [x2, wr, wl]
    in_specs = [
        pl.BlockSpec((tm_eff, D), lambda i, j: (i, 0)),   # x row tile (resident over j)
        pl.BlockSpec((R, D),      lambda i, j: (0, 0)),   # Wr full (tiny, resident)
        pl.BlockSpec((tn_eff, R), lambda i, j: (j, 0)),   # Wl N-block
    ]
    if has_sparse:
        inputs.append(sparse_w.astype(cdt))               # (O, D)
        in_specs.append(pl.BlockSpec((tn_eff, D), lambda i, j: (j, 0)))
    if has_bias:
        inputs.append(bias.astype(jnp.float32).reshape(1, O))
        in_specs.append(pl.BlockSpec((1, tn_eff), lambda i, j: (0, j)))

    out_spec = pl.BlockSpec((tm_eff, tn_eff), lambda i, j: (i, j))

    # --- Explicit VMEM budget (double-buffered tiles + scratch + headroom). --
    cbytes = cdt.itemsize
    per_step = (tm_eff * D + R * D + tn_eff * R) * cbytes
    if has_sparse:
        per_step += tn_eff * D * cbytes
    if has_bias:
        per_step += tn_eff * 4
    per_step += tm_eff * tn_eff * jnp.dtype(out_dtype).itemsize
    scratch_bytes = tm_eff * _round_up(R, 128) * 4
    try:
        phys_vmem = pltpu.get_tpu_info().vmem_capacity_bytes
    except Exception:
        phys_vmem = 64 << 20  # conservative: v7x per-TensorCore
    vmem_cap = int(phys_vmem * 0.85)
    vmem_limit = int(min(max(2 * per_step + scratch_bytes + (4 << 20), 32 << 20),
                         vmem_cap))

    kernel = functools.partial(_losparse_kernel,
                               has_sparse=has_sparse, has_bias=has_bias)

    out = pl.pallas_call(
        kernel,
        out_shape=jax.ShapeDtypeStruct((m_pad, O), out_dtype),
        grid_spec=pltpu.PrefetchScalarGridSpec(
            num_scalar_prefetch=0,
            # M outer (parallel), N inner: x tile + cached rx stay resident
            # across the inner N loop; weights stream block-by-block.
            grid=(m_blocks, n_blocks),
            in_specs=in_specs,
            out_specs=out_spec,
            scratch_shapes=[pltpu.VMEM((tm_eff, R), jnp.float32)],
        ),
        compiler_params=pltpu.CompilerParams(
            dimension_semantics=("parallel", "arbitrary"),
            vmem_limit_bytes=vmem_limit,
        ),
    )(*inputs)

    if m_pad != M:
        out = out[:M]
    return out.reshape(B, L, O)


if __name__ == "__main__":
    # Small shapes consistent with the module: x is (batch, seq, in_feature).
    B, L = 2, 8
    in_feature, out_feature, reduced_rank = 32, 32, 8

    key = jax.random.PRNGKey(0)
    kx, kr, kl, ks, kb = jax.random.split(key, 5)

    x = jax.random.normal(kx, (B, L, in_feature), dtype=jnp.float32)

    # Deterministic synthetic parameters (nn.Linear-style scale for the dense
    # factors; sparse/bias given small values so their contribution is exercised).
    right_w = jax.random.normal(kr, (reduced_rank, in_feature), jnp.float32) / jnp.sqrt(in_feature)
    left_w = jax.random.normal(kl, (out_feature, reduced_rank), jnp.float32) / jnp.sqrt(reduced_rank)
    sparse_w = 0.01 * jax.random.normal(ks, (out_feature, in_feature), jnp.float32)
    bias = 0.1 * jax.random.normal(kb, (out_feature,), jnp.float32)

    # Pure-JAX references (same math as the PyTorch forward, non-pruned path).
    ref_full = (x @ right_w.T) @ left_w.T + x @ sparse_w.T + bias
    ref_lr = (x @ right_w.T) @ left_w.T

    # 1) f32, full path (sparse + bias).
    out = jax.block_until_ready(linear_losparse(x, right_w, left_w, sparse_w, bias))
    assert out.shape == (B, L, out_feature)
    assert jnp.allclose(out, ref_full, atol=1e-4, rtol=1e-4)

    # 2) Specialized path: has_sparse=False, has_bias=False (no zero matmuls compiled).
    out_lr = jax.block_until_ready(linear_losparse(x, right_w, left_w, None, None))
    assert jnp.allclose(out_lr, ref_lr, atol=1e-4, rtol=1e-4)

    # 3) bf16 compute path (f32 accumulation + f32 bias epilogue) -> looser tolerance.
    out_bf16 = jax.block_until_ready(
        linear_losparse(x, right_w, left_w, sparse_w, bias, compute_dtype=jnp.bfloat16))
    assert jnp.allclose(out_bf16.astype(jnp.float32), ref_full, atol=0.15, rtol=0.05)

    # 4) Multi-block grid (m_blocks=2, n_blocks=2) to exercise the cached-rx
    #    path across the inner N loop and the pl.when(j == 0) initialization.
    B2, L2, D2, O2, R2 = 2, 8, 128, 256, 8
    k2 = jax.random.split(key, 6)
    x_b = jax.random.normal(k2[0], (B2, L2, D2), jnp.float32)
    rw_b = jax.random.normal(k2[1], (R2, D2), jnp.float32) / jnp.sqrt(D2)
    lw_b = jax.random.normal(k2[2], (O2, R2), jnp.float32) / jnp.sqrt(R2)
    sw_b = 0.01 * jax.random.normal(k2[3], (O2, D2), jnp.float32)
    b_b = 0.1 * jax.random.normal(k2[4], (O2,), jnp.float32)
    ref_b = (x_b @ rw_b.T) @ lw_b.T + x_b @ sw_b.T + b_b
    out_b = jax.block_until_ready(
        linear_losparse(x_b, rw_b, lw_b, sw_b, b_b, tm=8, tn=128))
    assert out_b.shape == (B2, L2, O2)
    assert jnp.allclose(out_b, ref_b, atol=2e-3, rtol=2e-3)

    print("KERNEL_OK")
</pallas_src>

<mosaic_0001>
module attributes {stable_mosaic.version = 11 : i64} {
  func.func @_losparse_kernel(%arg0: i32, %arg1: i32, %arg2: memref<16x32xf32, #tpu.memory_space<vmem>>, %arg3: memref<8x32xf32, #tpu.memory_space<vmem>>, %arg4: memref<32x8xf32, #tpu.memory_space<vmem>>, %arg5: memref<32x32xf32, #tpu.memory_space<vmem>>, %arg6: memref<1x32xf32, #tpu.memory_space<vmem>>, %arg7: memref<16x32xf32, #tpu.memory_space<vmem>>, %arg8: memref<16x8xf32, #tpu.memory_space<vmem>>) attributes {dimension_semantics = [#tpu.dimension_semantics<parallel>, #tpu.dimension_semantics<arbitrary>], iteration_bounds = array<i64: 1, 1>, scalar_prefetch = 0 : i64, scratch_operands = 1 : i64, tpu.core_type = #tpu.core_type<tc>, window_params = [{transform_indices = @transform_0, window_bounds = array<i64: 16, 32>}, {pipeline_mode = #tpu.pipeline_mode<synchronous>, transform_indices = @transform_1, window_bounds = array<i64: 8, 32>}, {transform_indices = @transform_2, window_bounds = array<i64: 32, 8>}, {transform_indices = @transform_3, window_bounds = array<i64: 32, 32>}, {transform_indices = @transform_4, window_bounds = array<i64: 1, 32>}, {transform_indices = @transform_5, window_bounds = array<i64: 16, 32>}]} {
    %c0_i32 = arith.constant 0 : i32
    %0 = arith.cmpi eq, %arg1, %c0_i32 : i32
    %1 = arith.extui %0 : i1 to i32
    %c0_i32_0 = arith.constant 0 : i32
    %2 = arith.cmpi ne, %1, %c0_i32_0 : i32
    scf.if %2 {
      %c0_13 = arith.constant 0 : index
      %c0_14 = arith.constant 0 : index
      %14 = vector.load %arg2[%c0_13, %c0_14] : memref<16x32xf32, #tpu.memory_space<vmem>>, vector<16x32xf32>
      %c0_15 = arith.constant 0 : index
      %c0_16 = arith.constant 0 : index
      %15 = vector.load %arg3[%c0_15, %c0_16] : memref<8x32xf32, #tpu.memory_space<vmem>>, vector<8x32xf32>
      %cst_17 = arith.constant dense<0.000000e+00> : vector<16x8xf32>
      %16 = tpu.matmul %14, %15, %cst_17 {dimension_numbers = #tpu.dot_dimension_numbers<[1], [1], [0], [0], [0, 0, 1, 0], [], []>} : vector<16x32xf32>, vector<8x32xf32>, vector<16x8xf32> -> vector<16x8xf32>
      %c0_18 = arith.constant 0 : index
      %c0_19 = arith.constant 0 : index
      %17 = vector.load %arg8[%c0_18, %c0_19] : memref<16x8xf32, #tpu.memory_space<vmem>>, vector<16x8xf32>
      tpu.vector_store %arg8[%c0_18, %c0_19], %16 {strides = array<i32>} : memref<16x8xf32, #tpu.memory_space<vmem>>, vector<16x8xf32>,
    } else {
    }
    %c0 = arith.constant 0 : index
    %c0_1 = arith.constant 0 : index
    %3 = vector.load %arg8[%c0, %c0_1] : memref<16x8xf32, #tpu.memory_space<vmem>>, vector<16x8xf32>
    %c0_2 = arith.constant 0 : index
    %c0_3 = arith.constant 0 : index
    %4 = vector.load %arg4[%c0_2, %c0_3] : memref<32x8xf32, #tpu.memory_space<vmem>>, vector<32x8xf32>
    %cst = arith.constant dense<0.000000e+00> : vector<16x32xf32>
    %5 = tpu.matmul %3, %4, %cst {dimension_numbers = #tpu.dot_dimension_numbers<[1], [1], [0], [0], [0, 0, 1, 0], [], []>} : vector<16x8xf32>, vector<32x8xf32>, vector<16x32xf32> -> vector<16x32xf32>
    %c0_4 = arith.constant 0 : index
    %c0_5 = arith.constant 0 : index
    %6 = vector.load %arg2[%c0_4, %c0_5] : memref<16x32xf32, #tpu.memory_space<vmem>>, vector<16x32xf32>
    %c0_6 = arith.constant 0 : index
    %c0_7 = arith.constant 0 : index
    %7 = vector.load %arg5[%c0_6, %c0_7] : memref<32x32xf32, #tpu.memory_space<vmem>>, vector<32x32xf32>
    %cst_8 = arith.constant dense<0.000000e+00> : vector<16x32xf32>
    %8 = tpu.matmul %6, %7, %cst_8 {dimension_numbers = #tpu.dot_dimension_numbers<[1], [1], [0], [0], [0, 0, 1, 0], [], []>} : vector<16x32xf32>, vector<32x32xf32>, vector<16x32xf32> -> vector<16x32xf32>
    %9 = arith.addf %5, %8 : vector<16x32xf32>
    %c0_9 = arith.constant 0 : index
    %c0_10 = arith.constant 0 : index
    %10 = vector.load %arg6[%c0_9, %c0_10] : memref<1x32xf32, #tpu.memory_space<vmem>>, vector<1x32xf32>
    %11 = vector.broadcast %10 : vector<1x32xf32> to vector<16x32xf32>
    %12 = arith.addf %9, %11 : vector<16x32xf32>
    %c0_11 = arith.constant 0 : index
    %c0_12 = arith.constant 0 : index
    %13 = vector.load %arg7[%c0_11, %c0_12] : memref<16x32xf32, #tpu.memory_space<vmem>>, vector<16x32xf32>
    tpu.vector_store %arg7[%c0_11, %c0_12], %12 {strides = array<i32>} : memref<16x32xf32, #tpu.memory_space<vmem>>, vector<16x32xf32>,
    return
  }
  func.func @transform_0(%arg0: i32, %arg1: i32) -> (i32, i32) {
    %c0_i32 = arith.constant 0 : i32
    %c0_i32_0 = arith.constant 0 : i32
    return %arg0, %c0_i32 : i32, i32
  }
  func.func @transform_1(%arg0: i32, %arg1: i32) -> (i32, i32) {
    %c0_i32 = arith.constant 0 : i32
    %c0_i32_0 = arith.constant 0 : i32
    %c0_i32_1 = arith.constant 0 : i32
    return %c0_i32, %c0_i32_0 : i32, i32
  }
  func.func @transform_2(%arg0: i32, %arg1: i32) -> (i32, i32) {
    %c0_i32 = arith.constant 0 : i32
    %c0_i32_0 = arith.constant 0 : i32
    return %arg1, %c0_i32 : i32, i32
  }
  func.func @transform_3(%arg0: i32, %arg1: i32) -> (i32, i32) {
    %c0_i32 = arith.constant 0 : i32
    %c0_i32_0 = arith.constant 0 : i32
    return %arg1, %c0_i32 : i32, i32
  }
  func.func @transform_4(%arg0: i32, %arg1: i32) -> (i32, i32) {
    %c0_i32 = arith.constant 0 : i32
    %c0_i32_0 = arith.constant 0 : i32
    return %c0_i32, %arg1 : i32, i32
  }
  func.func @transform_5(%arg0: i32, %arg1: i32) -> (i32, i32) {
    %c0_i32 = arith.constant 0 : i32
    return %arg0, %arg1 : i32, i32
  }
}

</mosaic_0001>

<bundles_post_ra>
// kernel: tpu_custom_call.1
= control target key start
LH: loop header
LB: loop body
LE: loop exit
PB: predicated region body
PF: predicated region fallthrough
CT: control target
= control target key end

     0   :  { %10 = vsyncpa [#allocation4], 0  ;;  %s623_s0 = inlined_call_operand.vmem [shape: f32[16,32], index: 0, kind: input, shape index: {}]   ;;  %s624_s1 = inlined_call_operand.hbm [shape: f32[8,32], index: 1, kind: input, shape index: {}]   ;;  %s625_s2 = inlined_call_operand.vmem [shape: f32[32,8], index: 2, kind: input, shape index: {}]   ;;  %s626_s3 = inlined_call_operand.vmem [shape: f32[32,32], index: 3, kind: input, shape index: {}]   ;;  %s627_s4 = inlined_call_operand.vmem [shape: f32[1,32], index: 4, kind: input, shape index: {}]   ;;  %s628_s5 = inlined_call_operand.hbm [shape: f32[16,32], index: 5, kind: output, shape index: {}]  }
   0x1   :  { %11 = vsyncpa [#allocation5], 0  ;;  %s492_s18 = smov [#allocation3]   ;;  %s444_s22 = scalar_lea.hbm %s624_s1, 128 }
   0x2   :  { %s20_s19 = sshll.u32 %s492_s18, 4  ;;  %p445_p0 = scmp.ne.s32.totalorder %s624_s1, %s444_s22  ;;  %s21_s19 = int_to_ptr.vmem [resolvable:$true] %s20_s19 }
   0x3   :  { %p448_p1 = scmp.lt.u32.totalorder %s444_s22, %s624_s1 }
   0x5   :  { %p450_p2 = pnand %p448_p1, %p445_p0 }
   0x7   :  { %453 = shalt.err (!%p450_p2)
}
   0x8   :  { %s454_s27 = scalar_lea.vmem %s21_s19, 128  ;;  %p459_p4 = scmp.lt.s32.totalorder %s21_s19, %s21_s19 }
   0x9   :  { %p455_p3 = scmp.ne.s32.totalorder %s21_s19, %s454_s27  ;;  %p460_p5 = scmp.lt.s32.totalorder %s454_s27, %s454_s27 }
   0xb   :  { %p461_p6 = por %p460_p5, %p459_p4 }
   0xd   :  { %p462_p7 = pnand %p461_p6, %p455_p3 }
   0xf   :  { %465 = shalt.err (!%p462_p7)
}
  0x10   :  { %23 = dma.hbm_to_vmem [thread:$0]  %s624_s1, 128, %s21_s19, [#allocation4]  }
  0x11   :  { %488 = dma.done.wait [#allocation4], 128  }
  0x12   :  { %489 = vsyncadd [#allocation4], 4294967168  ;;  %vm40_vm0 = vcmask 261120   ;;  %vm125_vm1 = vcmask 64512   ;;  %v39_v0 = vld [vmem:[#allocation3] sm:$0xff]  ;;  %v37_v1 = vld [vmem:[%s623_s0] sm:$0xff] }
  0x13   :  { %vm543_vm2 = vmpackc.low %vm40_vm0, %vm40_vm0  ;;  %387 = vmatprep.subr.msk.mxu0 %vm40_vm0, %v39_v0  ;;  %389 = vmatprep.mubr.msk.f32.mxu0 %vm40_vm0, %v37_v1  ;;  %v136_v3 = vld [vmem:[%s626_s3] sm:$0xff]  ;;  %v137_v4 = vld [vmem:[%s626_s3 + $0x8] sm:$0xff]  ;;  %s493_s23 = smov [#allocation6]  }
  0x14   :  { %v130_v5 = vld [vmem:[%s625_s2] sm:$0xff]  ;;  %388 = vmatpush3.xpose.msk.msra.mxu0 %vm40_vm0, %v39_v0  ;;  %v38_v6 = vld [vmem:[%s623_s0 + $0x8] sm:$0xff]  ;;  %v414_v7 = vpack.c.bf16 %v137_v4, %v136_v3  ;;  %vm567_vm3 = vmpackc.low %vm125_vm1, %vm125_vm1  ;;  %s344_s24 = sshll.u32 %s493_s23, 4  ;;  %s345_s24 = int_to_ptr.vmem [resolvable:$true] %s344_s24 }
  0x15   :  { %v131_v8 = vld [vmem:[%s625_s2 + $0x8] sm:$0xff]  ;;  %v138_v11 = vld [vmem:[%s626_s3 + $0x10] sm:$0xff]  ;;  %v139_v12 = vld [vmem:[%s626_s3 + $0x18] sm:$0xff]  ;;  %s466_s25 = scalar_lea.vmem %s345_s24, 256  ;;  %p471_p9 = scmp.lt.s32.totalorder %s345_s24, %s345_s24 }
  0x16   :  { %v426_v10 = vpack.c.bf16 %v131_v8, %v130_v5  ;;  %416 = vmatprep.subr.msk.bf16.mxu0 %vm543_vm2, %v414_v7  ;;  %v420_v13 = vpack.c.bf16 %v139_v12, %v138_v11  ;;  %v132_v14 = vld [vmem:[%s625_s2 + $0x10] sm:$0xff]  ;;  %v133_v15 = vld [vmem:[%s625_s2 + $0x18] sm:$0xff]  ;;  %v371_v24 = vld [vmem:[%s627_s4] ss:$0 sm:$0xff]  ;;  %p467_p8 = scmp.ne.s32.totalorder %s345_s24, %s466_s25  ;;  %p472_p10 = scmp.lt.s32.totalorder %s466_s25, %s466_s25 }
  0x17   :  { %390 = vmatmul.mubr.msk.f32.vlgmr.msra.gmra.mrb[0].mxu0 %vm40_vm0, %v38_v6  ;;  %v432_v16 = vpack.c.bf16 %v133_v15, %v132_v14 }
  0x18   :  { %428 = vmatprep.subr.msk.bf16.mxu1 %vm567_vm3, %v426_v10  ;;  %419 = vmatpush3.bf16.xpose.msk.msra.mxu0 %vm543_vm2, %v414_v7  ;;  %p473_p11 = por %p472_p10, %p471_p9 }
  0x19   :  { %431 = vmatpush3.bf16.xpose.msk.msra.mxu1 %vm567_vm3, %v426_v10  ;;  %400 = vmatprep.mubr.msk.f32.mxu0 %vm40_vm0, %v37_v1 }
  0x1a   :  { %422 = vmatprep.subr.msk.bf16.mxu0 %vm543_vm2, %v420_v13  ;;  %434 = vmatprep.subr.msk.bf16.mxu1 %vm567_vm3, %v432_v16  ;;  %p474_p12 = pnand %p473_p11, %p467_p8 }
  0x20   :  { %425 = vmatpush3.bf16.xpose.msk.msra.mxu0 %vm543_vm2, %v420_v13 }
  0x21   :  { %437 = vmatpush3.bf16.xpose.msk.msra.mxu1 %vm567_vm3, %v432_v16 }
  0x27   :  { %401 = vmatmul.mubr.msk.f32.vlgmr.msra.gmra.mrb[2].mxu0 %vm40_vm0, %v38_v6 }
  0xea   :  { %v391_v17 = vpop.f32.mrb[0].mxu0 }
  0xeb   :  { %127 = vst.msk [vmem:[#allocation2 + $0x8] sm:$0xff] %vm125_vm1, %v391_v17  ;;  %v116_v18 = vpop.f32.mrb[1].mxu0 }
  0xec   :  { %126 = vst.msk [vmem:[#allocation2] sm:$0xff] %vm125_vm1, %v116_v18 }
  0xf2   :  { %v129_v20 = vld [vmem:[#allocation2 + $0x8] sm:$0xff] }
  0xf3   :  { %v128_v19 = vld [vmem:[#allocation2] sm:$0xff] }
  0xf4   :  { %411 = vmatprep.mubr.msk.f32.mxu1 %vm125_vm1, %v128_v19 }
  0xf5   :  { %412 = vmatmul.mubr.msk.f32.vlgmr.msra.gmra.mrb[0].mxu1 %vm125_vm1, %v129_v20 }
  0xfa   :  { %v402_v21 = vpop.f32.mrb[2].mxu0 }
  0xfb   :  { %v225_v22 = vpop.f32.mrb[3].mxu0 }
 0x1c8   :  { %v413_v23 = vpop.f32.mrb[0].mxu1 }
 0x1c9   :  { %v325_v25 = vadd.f32 %v413_v23, %v402_v21  ;;  %v319_v26 = vpop.f32.mrb[1].mxu1 }
 0x1ca   :  { %v320_v27 = vadd.f32 %v319_v26, %v225_v22 }
 0x1cb   :  { %v336_v28 = vadd.f32 %v371_v24, %v325_v25 }
 0x1cc   :  { %v335_v29 = vadd.f32 %v371_v24, %v320_v27 }
 0x1cd   :  { %338 = vst.msk [vmem:[#allocation6 + $0x8] sm:$0xff] %vm40_vm0, %v336_v28 }
 0x1ce   :  { %337 = vst.msk [vmem:[#allocation6] sm:$0xff] %vm40_vm0, %v335_v29 }
 0x1cf   :  { %477 = shalt.err (!%p474_p12)
}
 0x1d0   :  { %s478_s27 = scalar_lea.hbm %s628_s5, 256 }
 0x1d1   :  { %p479_p13 = scmp.ne.s32.totalorder %s628_s5, %s478_s27  ;;  %p482_p0 = scmp.lt.u32.totalorder %s478_s27, %s628_s5 }
 0x1d3   :  { %p484_p1 = pnand %p482_p0, %p479_p13 }
 0x1d5   :  { %487 = shalt.err (!%p484_p1)
}
 0x1d6   :  { %s494_s1 = smov 128   ;;  %s495_s7 = smov 8  }
 0x1d7   :  { %350 = dma.vmem_to_hbm [thread:$0]  %s345_s24, 256, %s628_s5, [#allocation5], %s494_s1, %s494_s1, %s495_s7  }
 0x1d8   :  { %490 = dma.done.wait [#allocation5], 256  }
 0x1d9   :  { %491 = vsyncadd [#allocation5], 4294967040 }
 0x1da   :  { %354 = vsyncpa [#allocation4], 1 }
 0x1db   :  { %355 = vsyncpa [#allocation5], 1 }

</bundles_post_ra>
